<compile_context>
chip_gen: v6e
topology: v6e:2x2x1
jax: 0.10.0
libtpu: 0.0.40
codegen_flags: <defaults>
</compile_context>

<pallas_src>
import functools

import numpy as np
import jax
import jax.numpy as jnp
from jax.experimental import pallas as pl
from jax.experimental.pallas import tpu as pltpu


# ----------------------------------------------------------------------------
# small helpers
# ----------------------------------------------------------------------------
def _round_up(x, m):
    return (x + m - 1) // m * m


def _pad2(a, rows, cols):
    r, c = a.shape
    if (r, c) == (rows, cols):
        return a
    return jnp.pad(a, ((0, rows - r), (0, cols - c)))


def _apply_act(y, act):
    if act == "relu":
        return jnp.maximum(y, 0.0)
    if act == "gelu":
        return jax.nn.gelu(y)
    if act == "sigmoid":
        return jax.nn.sigmoid(y)
    return y


def _pick_tiles_mn(M, N):
    if M <= 256:
        Mp = _round_up(M, 8)
        tm = Mp
    else:
        tm = 256
        Mp = _round_up(M, tm)
    if N < 128:
        Np = _round_up(N, 8)
        tn = Np
    else:
        Np = _round_up(N, 128)
        tn = 256 if Np % 256 == 0 else 128
    return Mp, tm, Np, tn


def _pick_tiles_k(K):
    if K <= 512:
        Kp = _round_up(K, 8)
        return Kp, Kp
    return _round_up(K, 512), 512


# ----------------------------------------------------------------------------
# tiled matmul kernels (bf16 MXU, f32 accumulation, fused epilogues)
# ----------------------------------------------------------------------------
def _mm_kernel(x_ref, w_ref, b_ref, o_ref, acc_ref, *, act):
    @pl.when(pl.program_id(2) == 0)
    def _():
        acc_ref[...] = jnp.zeros_like(acc_ref)

    acc_ref[...] += jnp.dot(x_ref[...], w_ref[...],
                            preferred_element_type=jnp.float32)

    @pl.when(pl.program_id(2) == pl.num_programs(2) - 1)
    def _():
        o_ref[...] = _apply_act(acc_ref[...] + b_ref[...], act)


def _mm_res_kernel(x_ref, w_ref, b_ref, r_ref, o_ref, acc_ref, *, act):
    @pl.when(pl.program_id(2) == 0)
    def _():
        acc_ref[...] = jnp.zeros_like(acc_ref)

    acc_ref[...] += jnp.dot(x_ref[...], w_ref[...],
                            preferred_element_type=jnp.float32)

    @pl.when(pl.program_id(2) == pl.num_programs(2) - 1)
    def _():
        o_ref[...] = _apply_act(acc_ref[...] + b_ref[...], act) + r_ref[...]


def matmul_bias(x, w, b, act="none", residual=None):
    """(M,K)@(K,N) + b (+residual), tiled / pipelined, bf16 inputs, f32 out."""
    M, K = x.shape
    _, N = w.shape
    Mp, tm, Np, tn = _pick_tiles_mn(M, N)
    Kp, tk = _pick_tiles_k(K)
    nk = Kp // tk

    xp = _pad2(x, Mp, Kp).astype(jnp.bfloat16)
    wp = _pad2(w, Kp, Np).astype(jnp.bfloat16)
    bp = _pad2(b.reshape(1, N).astype(jnp.float32), 1, Np)

    in_specs = [
        pl.BlockSpec((tm, tk), lambda i, j, k: (i, k)),
        pl.BlockSpec((tk, tn), lambda i, j, k: (k, j)),
        pl.BlockSpec((1, tn), lambda i, j, k: (0, j)),
    ]
    args = [xp, wp, bp]
    if residual is not None:
        rp = _pad2(residual.astype(jnp.float32), Mp, Np)
        in_specs.append(pl.BlockSpec((tm, tn), lambda i, j, k: (i, j)))
        args.append(rp)
        kern = functools.partial(_mm_res_kernel, act=act)
    else:
        kern = functools.partial(_mm_kernel, act=act)

    out = pl.pallas_call(
        kern,
        out_shape=jax.ShapeDtypeStruct((Mp, Np), jnp.float32),
        grid=(Mp // tm, Np // tn, nk),
        in_specs=in_specs,
        out_specs=pl.BlockSpec((tm, tn), lambda i, j, k: (i, j)),
        scratch_shapes=[pltpu.VMEM((tm, tn), jnp.float32)],
        compiler_params=pltpu.CompilerParams(
            dimension_semantics=("parallel", "parallel", "arbitrary")),
    )(*args)
    if (Mp, Np) != (M, N):
        out = out[:M, :N]
    return out


def _ln_mm_kernel(x_ref, g_ref, bb_ref, w_ref, b_ref, o_ref, *, act):
    x = x_ref[...]
    mu = jnp.mean(x, axis=-1, keepdims=True)
    xc = x - mu
    var = jnp.mean(xc * xc, axis=-1, keepdims=True)
    xn = xc * jax.lax.rsqrt(var + 1e-5) * g_ref[...] + bb_ref[...]
    y = jnp.dot(xn.astype(jnp.bfloat16), w_ref[...],
                preferred_element_type=jnp.float32) + b_ref[...]
    o_ref[...] = _apply_act(y, act)


def ln_matmul_bias(x, ln_g, ln_b, w, b, act="none"):
    """LayerNorm(x) @ w + b fused into one kernel (full K per block)."""
    M, K = x.shape
    _, N = w.shape
    if K % 8 != 0:
        # TODO(synk): non-8-aligned embed dims fall back to a JAX layernorm.
        mu = jnp.mean(x, -1, keepdims=True)
        var = jnp.var(x, -1, keepdims=True)
        xn = (x - mu) * jax.lax.rsqrt(var + 1e-5) * ln_g + ln_b
        return matmul_bias(xn, w, b, act)
    Mp, tm, Np, tn = _pick_tiles_mn(M, N)
    xp = _pad2(x.astype(jnp.float32), Mp, K)
    wp = _pad2(w, K, Np).astype(jnp.bfloat16)
    bp = _pad2(b.reshape(1, N).astype(jnp.float32), 1, Np)
    out = pl.pallas_call(
        functools.partial(_ln_mm_kernel, act=act),
        out_shape=jax.ShapeDtypeStruct((Mp, Np), jnp.float32),
        grid=(Mp // tm, Np // tn),
        in_specs=[
            pl.BlockSpec((tm, K), lambda i, j: (i, 0)),
            pl.BlockSpec((1, K), lambda i, j: (0, 0)),
            pl.BlockSpec((1, K), lambda i, j: (0, 0)),
            pl.BlockSpec((K, tn), lambda i, j: (0, j)),
            pl.BlockSpec((1, tn), lambda i, j: (0, j)),
        ],
        out_specs=pl.BlockSpec((tm, tn), lambda i, j: (i, j)),
        compiler_params=pltpu.CompilerParams(
            dimension_semantics=("parallel", "parallel")),
    )(xp, ln_g.reshape(1, K).astype(jnp.float32),
      ln_b.reshape(1, K).astype(jnp.float32), wp, bp)
    if (Mp, Np) != (M, N):
        out = out[:M, :N]
    return out


def _mm2_kernel(x1_ref, x2_ref, w1_ref, w2_ref, b_ref, o_ref, *, act):
    y = jnp.dot(x1_ref[...], w1_ref[...], preferred_element_type=jnp.float32)
    y = y + jnp.dot(x2_ref[...], w2_ref[...], preferred_element_type=jnp.float32)
    o_ref[...] = _apply_act(y + b_ref[...], act)


def matmul2_bias(x1, x2, w1, w2, b, act="none"):
    """x1@w1 + x2@w2 + b : replaces concat([x1,x2]) @ concat([w1;w2])."""
    M, K1 = x1.shape
    _, K2 = x2.shape
    N = w1.shape[1]
    Mp, tm, Np, tn = _pick_tiles_mn(M, N)
    K1p, K2p = _round_up(K1, 8), _round_up(K2, 8)
    x1p = _pad2(x1, Mp, K1p).astype(jnp.bfloat16)
    x2p = _pad2(x2, Mp, K2p).astype(jnp.bfloat16)
    w1p = _pad2(w1, K1p, Np).astype(jnp.bfloat16)
    w2p = _pad2(w2, K2p, Np).astype(jnp.bfloat16)
    bp = _pad2(b.reshape(1, N).astype(jnp.float32), 1, Np)
    out = pl.pallas_call(
        functools.partial(_mm2_kernel, act=act),
        out_shape=jax.ShapeDtypeStruct((Mp, Np), jnp.float32),
        grid=(Mp // tm, Np // tn),
        in_specs=[
            pl.BlockSpec((tm, K1p), lambda i, j: (i, 0)),
            pl.BlockSpec((tm, K2p), lambda i, j: (i, 0)),
            pl.BlockSpec((K1p, tn), lambda i, j: (0, j)),
            pl.BlockSpec((K2p, tn), lambda i, j: (0, j)),
            pl.BlockSpec((1, tn), lambda i, j: (0, j)),
        ],
        out_specs=pl.BlockSpec((tm, tn), lambda i, j: (i, j)),
        compiler_params=pltpu.CompilerParams(
            dimension_semantics=("parallel", "parallel")),
    )(x1p, x2p, w1p, w2p, bp)
    return out[:M, :N] if (Mp, Np) != (M, N) else out


# ----------------------------------------------------------------------------
# multi-head attention kernel  (grid over batch x head x query-tile)
# ----------------------------------------------------------------------------
def _mha_kernel(q_ref, k_ref, v_ref, o_ref, *, scale):
    q = q_ref[0, 0]
    k = k_ref[0, 0]
    v = v_ref[0, 0]
    s = jax.lax.dot_general(q, k, (((1,), (1,)), ((), ())),
                            preferred_element_type=jnp.float32) * scale
    s = s - jnp.max(s, axis=-1, keepdims=True)
    p = jnp.exp(s)
    p = p * pl.reciprocal(jnp.sum(p, axis=-1, keepdims=True), approx=True)
    o_ref[0, 0] = jnp.dot(p.astype(v.dtype), v,
                          preferred_element_type=jnp.float32)


def mha(q, k, v):
    """q/k/v: (B, heads, T, hd) bf16 -> (B, heads, T, hd) f32."""
    B, Hh, T, hd = q.shape
    scale = 1.0 / float(hd) ** 0.5
    if T <= 1024:
        tq, Tp = T, T
        qp = q
    else:
        tq = 256
        Tp = _round_up(T, tq)
        qp = jnp.pad(q, ((0, 0), (0, 0), (0, Tp - T), (0, 0)))
    out = pl.pallas_call(
        functools.partial(_mha_kernel, scale=scale),
        out_shape=jax.ShapeDtypeStruct((B, Hh, Tp, hd), jnp.float32),
        grid=(B, Hh, Tp // tq),
        in_specs=[
            pl.BlockSpec((1, 1, tq, hd), lambda b, h, i: (b, h, i, 0)),
            pl.BlockSpec((1, 1, T, hd), lambda b, h, i: (b, h, 0, 0)),
            pl.BlockSpec((1, 1, T, hd), lambda b, h, i: (b, h, 0, 0)),
        ],
        out_specs=pl.BlockSpec((1, 1, tq, hd), lambda b, h, i: (b, h, i, 0)),
        compiler_params=pltpu.CompilerParams(
            dimension_semantics=("parallel", "parallel", "parallel")),
    )(qp, k, v)
    return out[:, :, :T] if Tp != T else out


# ----------------------------------------------------------------------------
# bilinear resize (NHWC, separable matmuls) + image-pyramid kernels
# ----------------------------------------------------------------------------
def _bilinear_matrix(out_size, in_size):
    # PyTorch bilinear, align_corners=False (edge clamp).
    R = np.zeros((out_size, in_size), dtype=np.float32)
    if in_size == 1:
        R[:, 0] = 1.0
        return R
    for i in range(out_size):
        src = (i + 0.5) * in_size / out_size - 0.5
        src = min(max(src, 0.0), float(in_size - 1))
        i0 = int(np.floor(src))
        i1 = min(i0 + 1, in_size - 1)
        w = src - i0
        R[i, i0] += 1.0 - w
        R[i, i1] += w
    return R


def _blur_matrix(n):
    # 7-tap binomial Gaussian with edge-replicate boundary, as a banded matrix.
    taps = np.array([1, 6, 15, 20, 15, 6, 1], np.float32) / 64.0
    Bm = np.zeros((n, n), np.float32)
    for i in range(n):
        for k in range(7):
            j = min(max(i + k - 3, 0), n - 1)
            Bm[i, j] += taps[k]
    return Bm


def _resize_h_kernel(x_ref, rh_ref, o_ref):
    o_ref[0] = jnp.dot(rh_ref[...], x_ref[0], preferred_element_type=jnp.float32)


def _resize_w_kernel(x_ref, rw_ref, o_ref):
    o_ref[0, 0] = jnp.dot(rw_ref[...], x_ref[0, 0],
                          preferred_element_type=jnp.float32)


def bilinear_resize_nhwc(x, out_hw):
    """NHWC bilinear resize (align_corners=False), channels kept on lanes."""
    B, H1, W1, C = x.shape
    H2, W2 = out_hw
    if (H1, W1) == (H2, W2):
        return x
    rh = jnp.asarray(_bilinear_matrix(H2, H1))
    rw = jnp.asarray(_bilinear_matrix(W2, W1))
    # stage 1: H resize on (H1, W1*C) slabs (lane-dense)
    y1 = pl.pallas_call(
        _resize_h_kernel,
        out_shape=jax.ShapeDtypeStruct((B, H2, W1 * C), jnp.float32),
        grid=(B,),
        in_specs=[pl.BlockSpec((1, H1, W1 * C), lambda b: (b, 0, 0)),
                  pl.BlockSpec((H2, H1), lambda b: (0, 0))],
        out_specs=pl.BlockSpec((1, H2, W1 * C), lambda b: (b, 0, 0)),
        compiler_params=pltpu.CompilerParams(dimension_semantics=("parallel",)),
    )(x.reshape(B, H1, W1 * C), rh)
    # stage 2: W resize per output row, channels on lanes
    y2 = pl.pallas_call(
        _resize_w_kernel,
        out_shape=jax.ShapeDtypeStruct((B, H2, W2, C), jnp.float32),
        grid=(B, H2),
        in_specs=[pl.BlockSpec((1, 1, W1, C), lambda b, i: (b, i, 0, 0)),
                  pl.BlockSpec((W2, W1), lambda b, i: (0, 0))],
        out_specs=pl.BlockSpec((1, 1, W2, C), lambda b, i: (b, i, 0, 0)),
        compiler_params=pltpu.CompilerParams(
            dimension_semantics=("parallel", "parallel")),
    )(y1.reshape(B, H2, W1, C), rw)
    return y2


def _uncertain_kernel(s_ref, rh_ref, rwT_ref, o_ref):
    t = jnp.dot(rh_ref[...], s_ref[0], preferred_element_type=jnp.float32)
    u = jnp.dot(t, rwT_ref[...], preferred_element_type=jnp.float32)
    p = jax.nn.sigmoid(u)
    o_ref[0] = 1.0 - jnp.abs(2.0 * p - 1.0)


def pyramid_get_uncertain(s, size):
    # TODO(synk): ImagePyramid not provided; uncertainty = 1 - |2*sigmoid(resize(s))-1|.
    B, hs, ws, _ = s.shape
    Ho, Wo = size
    rh = jnp.asarray(_bilinear_matrix(Ho, hs))
    rwT = jnp.asarray(_bilinear_matrix(Wo, ws).T)
    out = pl.pallas_call(
        _uncertain_kernel,
        out_shape=jax.ShapeDtypeStruct((B, Ho, Wo), jnp.float32),
        grid=(B,),
        in_specs=[pl.BlockSpec((1, hs, ws), lambda b: (b, 0, 0)),
                  pl.BlockSpec((Ho, hs), lambda b: (0, 0)),
                  pl.BlockSpec((ws, Wo), lambda b: (0, 0))],
        out_specs=pl.BlockSpec((1, Ho, Wo), lambda b: (b, 0, 0)),
        compiler_params=pltpu.CompilerParams(dimension_semantics=("parallel",)),
    )(s.reshape(B, hs, ws), rh, rwT)
    return out.reshape(B, Ho, Wo, 1)


def _recon_kernel(d_ref, r_ref, ch_ref, cwT_ref, o_ref):
    t = jnp.dot(ch_ref[...], d_ref[0], preferred_element_type=jnp.float32)
    o_ref[0] = jnp.dot(t, cwT_ref[...],
                       preferred_element_type=jnp.float32) + r_ref[0]


def pyramid_reconstruct(d, r):
    # TODO(synk): ImagePyramid not provided; reconstruct = blur7x7(resize(d)) + r,
    # with resize+blur folded into pre-combined banded matrices (one kernel).
    B, hd_, wd_, _ = d.shape
    _, hr, wr, _ = r.shape
    ch = _blur_matrix(hr) @ _bilinear_matrix(hr, hd_)          # (hr, hd_)
    cwT = _bilinear_matrix(wr, wd_).T @ _blur_matrix(wr).T     # (wd_, wr)
    out = pl.pallas_call(
        _recon_kernel,
        out_shape=jax.ShapeDtypeStruct((B, hr, wr), jnp.float32),
        grid=(B,),
        in_specs=[pl.BlockSpec((1, hd_, wd_), lambda b: (b, 0, 0)),
                  pl.BlockSpec((1, hr, wr), lambda b: (b, 0, 0)),
                  pl.BlockSpec((hr, hd_), lambda b: (0, 0)),
                  pl.BlockSpec((wd_, wr), lambda b: (0, 0))],
        out_specs=pl.BlockSpec((1, hr, wr), lambda b: (b, 0, 0)),
        compiler_params=pltpu.CompilerParams(dimension_semantics=("parallel",)),
    )(d.reshape(B, hd_, wd_), r.reshape(B, hr, wr),
      jnp.asarray(ch), jnp.asarray(cwT))
    return out.reshape(B, hr, wr, 1)


# ----------------------------------------------------------------------------
# URA fused kernels
# ----------------------------------------------------------------------------
def _ura_g_kernel(f_ref, l_ref, c_ref, wf_ref, wl_ref, b_ref, o_ref):
    lc = (l_ref[...] * c_ref[...]).astype(jnp.bfloat16)
    y = jnp.dot(f_ref[...].astype(jnp.bfloat16), wf_ref[...],
                preferred_element_type=jnp.float32)
    y = y + jnp.dot(lc, wl_ref[...], preferred_element_type=jnp.float32)
    o_ref[...] = jnp.maximum(y + b_ref[...], 0.0)


def ura_gated_matmul(f, l, c, wf, wl, b):
    """relu(f@wf + (l*c)@wl + b)  -- l*c computed in-kernel (never materialized)."""
    M, K = f.shape
    N = wf.shape[1]
    Mp, tm, Np, tn = _pick_tiles_mn(M, N)
    Kp = _round_up(K, 8)
    out = pl.pallas_call(
        _ura_g_kernel,
        out_shape=jax.ShapeDtypeStruct((Mp, Np), jnp.float32),
        grid=(Mp // tm, Np // tn),
        in_specs=[
            pl.BlockSpec((tm, Kp), lambda i, j: (i, 0)),
            pl.BlockSpec((tm, Kp), lambda i, j: (i, 0)),
            pl.BlockSpec((tm, 1), lambda i, j: (i, 0)),
            pl.BlockSpec((Kp, tn), lambda i, j: (0, j)),
            pl.BlockSpec((Kp, tn), lambda i, j: (0, j)),
            pl.BlockSpec((1, tn), lambda i, j: (0, j)),
        ],
        out_specs=pl.BlockSpec((tm, tn), lambda i, j: (i, j)),
        compiler_params=pltpu.CompilerParams(
            dimension_semantics=("parallel", "parallel")),
    )(_pad2(f, Mp, Kp), _pad2(l, Mp, Kp), _pad2(c, Mp, 1),
      _pad2(wf, Kp, Np).astype(jnp.bfloat16),
      _pad2(wl, Kp, Np).astype(jnp.bfloat16),
      _pad2(b.reshape(1, N).astype(jnp.float32), 1, Np))
    return out[:M, :N] if (Mp, Np) != (M, N) else out


def _ura_tail_kernel(g_ref, f_ref, war_ref, bar_ref, wp_ref, bp_ref,
                     fo_ref, hd_ref):
    g = g_ref[...]
    f = f_ref[...]
    ar = jnp.dot(g.astype(jnp.bfloat16), war_ref[...],
                 preferred_element_type=jnp.float32) + bar_ref[...]
    a = ar[:, 0:1]
    fo = f + g * jax.nn.sigmoid(a)
    fo_ref[...] = fo
    p = jnp.dot(fo.astype(jnp.bfloat16), wp_ref[...],
                preferred_element_type=jnp.float32) + bp_ref[...]
    hd_ref[...] = ar + p            # col0 = a, col1 = r, col2 = p


def ura_tail(g, f, war, bar, wp, bp):
    """Fused a/r/p heads + uncertainty-gated residual (single kernel, 2 outputs)."""
    M, K = g.shape
    HP = war.shape[1]
    if M <= 512:
        Mp = _round_up(M, 8)
        tm = Mp
    else:
        tm = 512
        Mp = _round_up(M, tm)
    Kp = _round_up(K, 8)
    f_out, heads = pl.pallas_call(
        _ura_tail_kernel,
        out_shape=(jax.ShapeDtypeStruct((Mp, Kp), jnp.float32),
                   jax.ShapeDtypeStruct((Mp, HP), jnp.float32)),
        grid=(Mp // tm,),
        in_specs=[
            pl.BlockSpec((tm, Kp), lambda i: (i, 0)),
            pl.BlockSpec((tm, Kp), lambda i: (i, 0)),
            pl.BlockSpec((Kp, HP), lambda i: (0, 0)),
            pl.BlockSpec((1, HP), lambda i: (0, 0)),
            pl.BlockSpec((Kp, HP), lambda i: (0, 0)),
            pl.BlockSpec((1, HP), lambda i: (0, 0)),
        ],
        out_specs=(pl.BlockSpec((tm, Kp), lambda i: (i, 0)),
                   pl.BlockSpec((tm, HP), lambda i: (i, 0))),
        compiler_params=pltpu.CompilerParams(dimension_semantics=("parallel",)),
    )(_pad2(g, Mp, Kp), _pad2(f, Mp, Kp),
      _pad2(war, Kp, HP).astype(jnp.bfloat16), bar.astype(jnp.float32),
      _pad2(wp, Kp, HP).astype(jnp.bfloat16), bp.astype(jnp.float32))
    return f_out[:M, :K], heads[:M]


# ----------------------------------------------------------------------------
# sub-modules (stand-ins for MIA / SSCA / URA), channels-last
# ----------------------------------------------------------------------------
def conv1x1(x, w, b, act="none"):
    B, Hh, Ww, C = x.shape
    N = w.shape[1]
    y = matmul_bias(x.reshape(B * Hh * Ww, C), w, b, act)
    return y.reshape(B, Hh, Ww, N)


def transformer_block(pp, tok, B, T, E, num_heads):
    hd = E // num_heads
    qkv = ln_matmul_bias(tok, pp["ln1_g"], pp["ln1_b"], pp["qkv_w"], pp["qkv_b"])
    qkv = qkv.reshape(B, T, 3, num_heads, hd).transpose(2, 0, 3, 1, 4)
    qkv = qkv.astype(jnp.bfloat16)
    att = mha(qkv[0], qkv[1], qkv[2])                    # (B, heads, T, hd)
    att = att.transpose(0, 2, 1, 3).reshape(B * T, E)
    tok = matmul_bias(att, pp["o_w"], pp["o_b"], residual=tok)
    h = ln_matmul_bias(tok, pp["ln2_g"], pp["ln2_b"],
                       pp["mlp1_w"], pp["mlp1_b"], act="gelu")
    tok = matmul_bias(h, pp["mlp2_w"], pp["mlp2_b"], residual=tok)
    return tok


def mia_forward(pp, x, num_heads, fea_1=None):
    # TODO(synk): MIA definition not provided; modelled as token embedding
    # (+ resized cross-scale feature injection) + 1 transformer block + 1x1 out.
    B, Hh, Ww, C = x.shape
    T = Hh * Ww
    E = pp["proj_in_w"].shape[1]
    xf = x.reshape(B * T, C)
    if fea_1 is None:
        tok = matmul_bias(xf, pp["proj_in_w"], pp["proj_in_b"])
    else:
        fr = bilinear_resize_nhwc(fea_1, (Hh, Ww))
        ff = fr.reshape(B * T, fr.shape[-1])
        tok = matmul2_bias(xf, ff, pp["proj_in_w"], pp["fea1_w"], pp["proj_in_b"])
    tok = transformer_block(pp, tok, B, T, E, num_heads)
    out = matmul_bias(tok, pp["out_w"], pp["out_b"])
    return out.reshape(B, Hh, Ww, pp["out_w"].shape[1])


def ssca_forward(pp, xa, xb, num_heads):
    # TODO(synk): SSCA definition not provided; modelled as 1x1 fuse conv +
    # transformer block residual + saliency head.  Channel concat is replaced
    # by a dual-input accumulated matmul.
    B, Hh, Ww, dimc = xa.shape
    T = Hh * Ww
    E = pp["proj_w"].shape[1]
    g = matmul2_bias(xa.reshape(B * T, dimc), xb.reshape(B * T, dimc),
                     pp["cin_wa"], pp["cin_wb"], pp["cin_b"], act="relu")
    tok = matmul_bias(g, pp["proj_w"], pp["proj_b"])
    tok = transformer_block(pp, tok, B, T, E, num_heads)
    f = matmul_bias(tok, pp["back_w"], pp["back_b"], residual=g)
    s = matmul_bias(f, pp["sal_w"], pp["sal_b"])
    return f.reshape(B, Hh, Ww, dimc), s.reshape(B, Hh, Ww, 1)


def ura_forward(pp, f, l, c):
    # TODO(synk): URA definition not provided; modelled as uncertainty-gated
    # fusion of (f, l*c) with residual / prediction heads; timings set to 0.
    B, Hh, Ww, dimc = f.shape
    M = B * Hh * Ww
    ff = f.reshape(M, dimc)
    lf = l.reshape(M, dimc)
    cf = c.reshape(M, 1)
    g = ura_gated_matmul(ff, lf, cf, pp["g_wf"], pp["g_wl"], pp["g_b"])
    f_out, heads = ura_tail(g, ff, pp["war"], pp["bar"], pp["wp"], pp["bp"])
    r = heads[:, 1:2].reshape(B, Hh, Ww, 1)
    p_map = heads[:, 2:3].reshape(B, Hh, Ww, 1)
    return f_out.reshape(B, Hh, Ww, dimc), r, p_map, 0.0, 0.0


# ----------------------------------------------------------------------------
# parameter init (deterministic, synthetic)
# ----------------------------------------------------------------------------
def init_decoder_params(key, in_channels, dim):
    keys = iter(jax.random.split(key, 256))

    def p(shape, scale=0.02):
        return scale * jax.random.normal(next(keys), shape, jnp.float32)

    def zeros(shape):
        return jnp.zeros(shape, jnp.float32)

    def ones(shape):
        return jnp.ones(shape, jnp.float32)

    def transformer(embed):
        return dict(
            ln1_g=ones((embed,)), ln1_b=zeros((embed,)),
            qkv_w=p((embed, 3 * embed)), qkv_b=zeros((3 * embed,)),
            o_w=p((embed, embed)), o_b=zeros((embed,)),
            ln2_g=ones((embed,)), ln2_b=zeros((embed,)),
            mlp1_w=p((embed, 3 * embed)), mlp1_b=zeros((3 * embed,)),
            mlp2_w=p((3 * embed, embed)), mlp2_b=zeros((embed,)),
        )

    def mia(cin, embed, dim1=None):
        d = dict(proj_in_w=p((cin, embed)), proj_in_b=zeros((embed,)),
                 out_w=p((embed, dim)), out_b=zeros((dim,)),
                 **transformer(embed))
        if dim1 is not None:
            d["fea1_w"] = p((dim1, embed))
        return d

    def ssca(embed):
        return dict(cin_wa=p((dim, dim)), cin_wb=p((dim, dim)), cin_b=zeros((dim,)),
                    proj_w=p((dim, embed)), proj_b=zeros((embed,)),
                    back_w=p((embed, dim)), back_b=zeros((dim,)),
                    sal_w=p((dim, 1)), sal_b=zeros((1,)),
                    **transformer(embed))

    def ura():
        war = jnp.zeros((dim, 8), jnp.float32)
        war = war.at[:, 0:1].set(p((dim, 1))).at[:, 1:2].set(p((dim, 1)))
        wp = jnp.zeros((dim, 8), jnp.float32).at[:, 2:3].set(p((dim, 1)))
        return dict(g_wf=p((dim, dim)), g_wl=p((dim, dim)), g_b=zeros((dim,)),
                    war=war, bar=zeros((1, 8)), wp=wp, bp=zeros((1, 8)))

    params = dict(
        context5=mia(in_channels[4], dim * 16, None),
        context4=mia(in_channels[3], dim * 8, in_channels[4]),
        context3=mia(in_channels[2], dim * 4, in_channels[3]),
        context2=mia(in_channels[1], dim * 2, in_channels[2]),
        fusion4=ssca(dim * 8),
        fusion3=ssca(dim * 4),
        fusion2=ssca(dim * 2),
        attention2=ura(),
        attention1=ura(),
        attention0=ura(),
    )
    if dim != in_channels[0]:
        params["context1"] = dict(w=p((in_channels[0], dim)), b=zeros((dim,)))
    return params


# ----------------------------------------------------------------------------
# decoder forward (mirrors decoder.forward in the PyTorch reference)
# ----------------------------------------------------------------------------
def decoder_forward(params, x, mode, in_channels, dim, base_size):
    del mode  # unused, kept for signature parity
    H, W = base_size
    # NCHW -> NHWC once at the boundary; everything below is channels-last.
    x1_, x2_, x3_, x4_, x5_ = [jnp.transpose(t, (0, 2, 3, 1)) for t in x]

    x5 = mia_forward(params["context5"], x5_, num_heads=8)
    x4 = mia_forward(params["context4"], x4_, num_heads=4, fea_1=x5_)
    x3 = mia_forward(params["context3"], x3_, num_heads=2, fea_1=x4_)
    x2 = mia_forward(params["context2"], x2_, num_heads=1, fea_1=x3_)

    if dim == in_channels[0]:
        l = x1_
    else:
        l = conv1x1(x1_, params["context1"]["w"], params["context1"]["b"])

    f5 = bilinear_resize_nhwc(x5, (H // 16, W // 16))
    f4, s4 = ssca_forward(params["fusion4"], x4, f5, num_heads=4)
    f4 = bilinear_resize_nhwc(f4, (H // 8, W // 8))
    f3, s3 = ssca_forward(params["fusion3"], x3, f4, num_heads=2)
    f3 = bilinear_resize_nhwc(f3, (H // 4, W // 4))
    f2, s2 = ssca_forward(params["fusion2"], x2, f3, num_heads=1)

    c2 = pyramid_get_uncertain(s2, (H // 4, W // 4))
    f2, r2, p2, _, _ = ura_forward(params["attention2"], f2, l, c2)
    d2 = pyramid_reconstruct(s2, r2)

    c2 = pyramid_get_uncertain(d2, (H // 4, W // 4))
    f1, r1, p1, _, _ = ura_forward(params["attention1"], f2, l, c2)
    d1 = pyramid_reconstruct(d2, r1)

    c1 = pyramid_get_uncertain(d1, (H // 4, W // 4))
    _, r0, p0, _, _ = ura_forward(params["attention0"], f1, l, c1)
    d0 = pyramid_reconstruct(d1, r0)

    c0 = pyramid_get_uncertain(d2, (H, W))

    def to_nchw(t):  # all outputs are 1-channel maps
        return jnp.transpose(t, (0, 3, 1, 2))

    outs = (p2, p1, p0, c2, c1, c0, s4, s3, s2, r2, r1, r0, d2, d1, d0)
    return tuple(to_nchw(t) for t in outs)


# ----------------------------------------------------------------------------
# demo
# ----------------------------------------------------------------------------
if __name__ == "__main__":
    # Small, shape-consistent configuration (scaled down from the defaults).
    in_channels = [32, 32, 64, 128, 256]
    dim = 16
    base_size = [64, 64]
    B = 2
    H, W = base_size

    key = jax.random.PRNGKey(0)
    kp, k1, k2, k3, k4, k5 = jax.random.split(key, 6)
    params = init_decoder_params(kp, in_channels, dim)

    x1 = jax.random.normal(k1, (B, in_channels[0], H // 4, W // 4), jnp.float32)
    x2 = jax.random.normal(k2, (B, in_channels[1], H // 4, W // 4), jnp.float32)
    x3 = jax.random.normal(k3, (B, in_channels[2], H // 8, W // 8), jnp.float32)
    x4 = jax.random.normal(k4, (B, in_channels[3], H // 16, W // 16), jnp.float32)
    x5 = jax.random.normal(k5, (B, in_channels[4], H // 32, W // 32), jnp.float32)

    out = decoder_forward(params, (x1, x2, x3, x4, x5), mode="test",
                          in_channels=in_channels, dim=dim, base_size=base_size)
    for o in out:
        jax.block_until_ready(o)
    print("KERNEL_OK")
</pallas_src>

<mosaic_0001>
module attributes {stable_mosaic.version = 11 : i64} {
  func.func @_mm_kernel(%arg0: i32, %arg1: i32, %arg2: i32, %arg3: memref<8x256xbf16, #tpu.memory_space<vmem>>, %arg4: memref<256x256xbf16, #tpu.memory_space<vmem>>, %arg5: memref<1x256xf32, #tpu.memory_space<vmem>>, %arg6: memref<8x256xf32, #tpu.memory_space<vmem>>, %arg7: memref<8x256xf32, #tpu.memory_space<vmem>>) attributes {dimension_semantics = [#tpu.dimension_semantics<parallel>, #tpu.dimension_semantics<parallel>, #tpu.dimension_semantics<arbitrary>], iteration_bounds = array<i64: 1, 1, 1>, scalar_prefetch = 0 : i64, scratch_operands = 1 : i64, tpu.core_type = #tpu.core_type<tc>, window_params = [{transform_indices = @transform_0, window_bounds = array<i64: 8, 256>}, {transform_indices = @transform_1, window_bounds = array<i64: 256, 256>}, {transform_indices = @transform_2, window_bounds = array<i64: 1, 256>}, {transform_indices = @transform_3, window_bounds = array<i64: 8, 256>}]} {
    %c0_i32 = arith.constant 0 : i32
    %0 = arith.cmpi eq, %arg2, %c0_i32 : i32
    %1 = arith.extui %0 : i1 to i32
    %c0_i32_0 = arith.constant 0 : i32
    %2 = arith.cmpi ne, %1, %c0_i32_0 : i32
    scf.if %2 {
      %cst_10 = arith.constant 0.000000e+00 : f32
      %12 = vector.broadcast %cst_10 : f32 to vector<8x256xf32>
      %c0_11 = arith.constant 0 : index
      %c0_12 = arith.constant 0 : index
      %13 = vector.load %arg7[%c0_11, %c0_12] : memref<8x256xf32, #tpu.memory_space<vmem>>, vector<8x256xf32>
      tpu.vector_store %arg7[%c0_11, %c0_12], %12 {strides = array<i32>} : memref<8x256xf32, #tpu.memory_space<vmem>>, vector<8x256xf32>,
    } else {
    }
    %c0 = arith.constant 0 : index
    %c0_1 = arith.constant 0 : index
    %3 = vector.load %arg7[%c0, %c0_1] : memref<8x256xf32, #tpu.memory_space<vmem>>, vector<8x256xf32>
    %c0_2 = arith.constant 0 : index
    %c0_3 = arith.constant 0 : index
    %4 = vector.load %arg3[%c0_2, %c0_3] : memref<8x256xbf16, #tpu.memory_space<vmem>>, vector<8x256xbf16>
    %c0_4 = arith.constant 0 : index
    %c0_5 = arith.constant 0 : index
    %5 = vector.load %arg4[%c0_4, %c0_5] : memref<256x256xbf16, #tpu.memory_space<vmem>>, vector<256x256xbf16>
    %cst = arith.constant dense<0.000000e+00> : vector<8x256xf32>
    %6 = tpu.matmul %4, %5, %cst {dimension_numbers = #tpu.dot_dimension_numbers<[1], [0], [0], [1], [0, 0, 1, 1], [], []>} : vector<8x256xbf16>, vector<256x256xbf16>, vector<8x256xf32> -> vector<8x256xf32>
    %7 = arith.addf %3, %6 : vector<8x256xf32>
    %c0_6 = arith.constant 0 : index
    %c0_7 = arith.constant 0 : index
    %8 = vector.load %arg7[%c0_6, %c0_7] : memref<8x256xf32, #tpu.memory_space<vmem>>, vector<8x256xf32>
    tpu.vector_store %arg7[%c0_6, %c0_7], %7 {strides = array<i32>} : memref<8x256xf32, #tpu.memory_space<vmem>>, vector<8x256xf32>,
    %c0_i32_8 = arith.constant 0 : i32
    %9 = arith.cmpi eq, %arg2, %c0_i32_8 : i32
    %10 = arith.extui %9 : i1 to i32
    %c0_i32_9 = arith.constant 0 : i32
    %11 = arith.cmpi ne, %10, %c0_i32_9 : i32
    scf.if %11 {
      %c0_10 = arith.constant 0 : index
      %c0_11 = arith.constant 0 : index
      %12 = vector.load %arg7[%c0_10, %c0_11] : memref<8x256xf32, #tpu.memory_space<vmem>>, vector<8x256xf32>
      %c0_12 = arith.constant 0 : index
      %c0_13 = arith.constant 0 : index
      %13 = vector.load %arg5[%c0_12, %c0_13] : memref<1x256xf32, #tpu.memory_space<vmem>>, vector<1x256xf32>
      %14 = vector.broadcast %13 : vector<1x256xf32> to vector<8x256xf32>
      %15 = arith.addf %12, %14 : vector<8x256xf32>
      %c0_14 = arith.constant 0 : index
      %c0_15 = arith.constant 0 : index
      %16 = vector.load %arg6[%c0_14, %c0_15] : memref<8x256xf32, #tpu.memory_space<vmem>>, vector<8x256xf32>
      tpu.vector_store %arg6[%c0_14, %c0_15], %15 {strides = array<i32>} : memref<8x256xf32, #tpu.memory_space<vmem>>, vector<8x256xf32>,
    } else {
    }
    return
  }
  func.func @transform_0(%arg0: i32, %arg1: i32, %arg2: i32) -> (i32, i32) {
    %c0_i32 = arith.constant 0 : i32
    return %arg0, %arg2 : i32, i32
  }
  func.func @transform_1(%arg0: i32, %arg1: i32, %arg2: i32) -> (i32, i32) {
    %c0_i32 = arith.constant 0 : i32
    return %arg2, %arg1 : i32, i32
  }
  func.func @transform_2(%arg0: i32, %arg1: i32, %arg2: i32) -> (i32, i32) {
    %c0_i32 = arith.constant 0 : i32
    %c0_i32_0 = arith.constant 0 : i32
    return %c0_i32, %arg1 : i32, i32
  }
  func.func @transform_3(%arg0: i32, %arg1: i32, %arg2: i32) -> (i32, i32) {
    %c0_i32 = arith.constant 0 : i32
    return %arg0, %arg1 : i32, i32
  }
}

</mosaic_0001>

<bundles_post_ra>
// kernel: tpu_custom_call.1
= control target key start
LH: loop header
LB: loop body
LE: loop exit
PB: predicated region body
PF: predicated region fallthrough
CT: control target
= control target key end

     0   :  { %8 = vsyncpa [#allocation4], 0  ;;  %s523_s0 = inlined_call_operand.hbm [shape: bf16[8,256], index: 0, kind: input, shape index: {}]   ;;  %s524_s1 = inlined_call_operand.hbm [shape: bf16[256,256], index: 1, kind: input, shape index: {}]   ;;  %s525_s2 = inlined_call_operand.vmem [shape: f32[1,256], index: 2, kind: input, shape index: {}]   ;;  %s526_s3 = inlined_call_operand.hbm [shape: f32[8,256], index: 3, kind: output, shape index: {}]  }
   0x1   :  { %9 = vsyncpa [#allocation7], 0 }
   0x2   :  { %10 = vsyncpa [#allocation5], 0  ;;  %s486_s12 = smov [#allocation3]   ;;  %s487_s14 = smov [#allocation6]  }
   0x3   :  { %s17_s13 = sshll.u32 %s486_s12, 4  ;;  %s26_s15 = sshll.u32 %s487_s14, 4  ;;  %s18_s13 = int_to_ptr.vmem [resolvable:$true] %s17_s13  ;;  %s27_s15 = int_to_ptr.vmem [resolvable:$true] %s26_s15 }
   0x4   :  { %s428_s16 = scalar_lea.vmem %s18_s13, 128  ;;  %p433_p1 = scmp.lt.s32.totalorder %s18_s13, %s18_s13 }
   0x5   :  { %p429_p0 = scmp.ne.s32.totalorder %s18_s13, %s428_s16  ;;  %p434_p2 = scmp.lt.s32.totalorder %s428_s16, %s428_s16 }
   0x7   :  { %p435_p3 = por %p434_p2, %p433_p1 }
   0x9   :  { %p436_p4 = pnand %p435_p3, %p429_p0 }
   0xb   :  { %439 = shalt.err (!%p436_p4)
}
   0xc   :  { %20 = dma.hbm_to_vmem [thread:$0]  %s523_s0, 128, %s18_s13, [#allocation4]  }
   0xd   :  { %s448_s19 = scalar_lea.vmem %s27_s15, 4096  ;;  %p453_p6 = scmp.lt.s32.totalorder %s27_s15, %s27_s15 }
   0xe   :  { %p449_p5 = scmp.ne.s32.totalorder %s27_s15, %s448_s19  ;;  %p454_p7 = scmp.lt.s32.totalorder %s448_s19, %s448_s19 }
  0x10   :  { %p455_p8 = por %p454_p7, %p453_p6 }
  0x12   :  { %p456_p9 = pnand %p455_p8, %p449_p5 }
  0x14   :  { %459 = shalt.err (!%p456_p9)
}
  0x15   :  { %s488_s20 = smov 128   ;;  %s489_s21 = smov 8  }
  0x16   :  { %32 = dma.hbm_to_vmem [thread:$0]  %s524_s1, 4096, %s27_s15, [#allocation7], %s488_s20, %s488_s20, %s489_s21  }
  0x17   :  { %480 = dma.done.wait [#allocation4], 128  }
  0x18   :  { %481 = vsyncadd [#allocation4], 4294967168 }
  0x19   :  { %482 = dma.done.wait [#allocation7], 4096  }
  0x1a   :  { %483 = vsyncadd [#allocation7], 4294963200  ;;  %v370_v0 = vld [vmem:[#allocation6 + $0x74] ss:$8 sps:$4 sm:$0xff]   ;;  %v372_v1 = vld [vmem:[#allocation6 + $0x70] ss:$8 sps:$4 sm:$0xff]   ;;  %v301_v35 = vlaneseq }
  0x1b   :  { %249 = vmatprep.subr.bf16.mxu0 %v370_v0  ;;  %v373_v2 = vld [vmem:[#allocation6 + $0x64] ss:$8 sps:$4 sm:$0xff]   ;;  %v375_v3 = vld [vmem:[#allocation6 + $0x60] ss:$8 sps:$4 sm:$0xff]   ;;  %v376_v4 = vld [vmem:[#allocation6 + $0x54] ss:$8 sps:$4 sm:$0xff]  }
  0x1c   :  { %250 = vmatpush1.bf16.msra.mxu0 %v372_v1  ;;  %v378_v5 = vld [vmem:[#allocation6 + $0x50] ss:$8 sps:$4 sm:$0xff]   ;;  %v379_v6 = vld [vmem:[#allocation6 + $0x44] ss:$8 sps:$4 sm:$0xff]   ;;  %v381_v7 = vld [vmem:[#allocation6 + $0x40] ss:$8 sps:$4 sm:$0xff]  }
  0x1d   :  { %251 = vmatprep.subr.bf16.mxu0 %v373_v2  ;;  %v382_v8 = vld [vmem:[#allocation6 + $0x34] ss:$8 sps:$4 sm:$0xff]   ;;  %v384_v9 = vld [vmem:[#allocation6 + $0x30] ss:$8 sps:$4 sm:$0xff]   ;;  %v385_v10 = vld [vmem:[#allocation6 + $0x24] ss:$8 sps:$4 sm:$0xff]  }
  0x1e   :  { %v387_v11 = vld [vmem:[#allocation6 + $0x20] ss:$8 sps:$4 sm:$0xff]   ;;  %v388_v12 = vld [vmem:[#allocation6 + $0x14] ss:$8 sps:$4 sm:$0xff]   ;;  %v390_v15 = vld [vmem:[#allocation6 + $0x10] ss:$8 sps:$4 sm:$0xff]  }
  0x1f   :  { %v49_v13 = vld [vmem:[#allocation3] sm:$0xff]  ;;  %v391_v16 = vld [vmem:[#allocation6 + $0x4] ss:$8 sps:$4 sm:$0xff]   ;;  %v393_v17 = vld [vmem:[#allocation6] ss:$8 sps:$4 sm:$0xff]   ;;  %v302_v36 = vshrl.u32 %v301_v35, 7 }
  0x20   :  { %252 = vmatpush1.bf16.msra.mxu0 %v375_v3  ;;  %v332_v14 = vcombine.high %v49_v13, %v49_v13  ;;  %v394_v18 = vld [vmem:[#allocation6 + $0xf4] ss:$8 sps:$4 sm:$0xff]   ;;  %v396_v19 = vld [vmem:[#allocation6 + $0xf0] ss:$8 sps:$4 sm:$0xff]   ;;  %v397_v20 = vld [vmem:[#allocation6 + $0xe4] ss:$8 sps:$4 sm:$0xff]   ;;  %v331_v34 = vcombine.low %v49_v13, %v49_v13 }
  0x21   :  { %253 = vmatprep.subr.bf16.mxu0 %v376_v4  ;;  %v399_v21 = vld [vmem:[#allocation6 + $0xe0] ss:$8 sps:$4 sm:$0xff]   ;;  %v400_v22 = vld [vmem:[#allocation6 + $0xd4] ss:$8 sps:$4 sm:$0xff]   ;;  %v402_v23 = vld [vmem:[#allocation6 + $0xd0] ss:$8 sps:$4 sm:$0xff]  }
  0x22   :  { %281 = vmatprep.mubr.bf16.mxu0 %v332_v14  ;;  %v403_v24 = vld [vmem:[#allocation6 + $0xc4] ss:$8 sps:$4 sm:$0xff]   ;;  %v405_v25 = vld [vmem:[#allocation6 + $0xc0] ss:$8 sps:$4 sm:$0xff]   ;;  %v406_v26 = vld [vmem:[#allocation6 + $0xb4] ss:$8 sps:$4 sm:$0xff]  }
  0x23   :  { %v408_v27 = vld [vmem:[#allocation6 + $0xb0] ss:$8 sps:$4 sm:$0xff]   ;;  %v409_v28 = vld [vmem:[#allocation6 + $0xa4] ss:$8 sps:$4 sm:$0xff]   ;;  %v411_v29 = vld [vmem:[#allocation6 + $0xa0] ss:$8 sps:$4 sm:$0xff]  }
  0x24   :  { %254 = vmatpush1.bf16.msra.mxu0 %v378_v5  ;;  %v412_v30 = vld [vmem:[#allocation6 + $0x94] ss:$8 sps:$4 sm:$0xff]   ;;  %v414_v31 = vld [vmem:[#allocation6 + $0x90] ss:$8 sps:$4 sm:$0xff]   ;;  %v415_v32 = vld [vmem:[#allocation6 + $0x84] ss:$8 sps:$4 sm:$0xff]  }
  0x25   :  { %255 = vmatprep.subr.bf16.mxu0 %v379_v6  ;;  %v417_v33 = vld [vmem:[#allocation6 + $0x80] ss:$8 sps:$4 sm:$0xff]   ;;  %v303_v37 = vsub.s32 0, %v302_v36  ;;  %v299_v38 = vld [vmem:[%s525_s2] sm:$0x3]  ;;  %v307_v39 = vsub.s32 1, %v302_v36 }
  0x26   :  { %s490_s24 = smov [#allocation8]  }
  0x27   :  { %v304_v40 = vrot.slane %v299_v38, %v303_v37  ;;  %v308_v41 = vrot.slane %v299_v38, %v307_v39  ;;  %s321_s25 = sshll.u32 %s490_s24, 4  ;;  %s322_s25 = int_to_ptr.vmem [resolvable:$true] %s321_s25 }
  0x28   :  { %256 = vmatpush1.bf16.msra.mxu0 %v381_v7  ;;  %s460_s26 = scalar_lea.vmem %s322_s25, 256  ;;  %p465_p11 = scmp.lt.s32.totalorder %s322_s25, %s322_s25 }
  0x29   :  { %257 = vmatprep.subr.bf16.mxu0 %v382_v8  ;;  %p461_p10 = scmp.ne.s32.totalorder %s322_s25, %s460_s26  ;;  %p466_p12 = scmp.lt.s32.totalorder %s460_s26, %s460_s26 }
  0x2b   :  { %p467_p13 = por %p466_p12, %p465_p11 }
  0x2c   :  { %258 = vmatpush1.bf16.msra.mxu0 %v384_v9 }
  0x2d   :  { %259 = vmatprep.subr.bf16.mxu0 %v385_v10  ;;  %p468_p0 = pnand %p467_p13, %p461_p10 }
  0x30   :  { %260 = vmatpush1.bf16.msra.mxu0 %v387_v11 }
  0x31   :  { %261 = vmatprep.subr.bf16.mxu0 %v388_v12 }
  0x34   :  { %262 = vmatpush1.bf16.msra.mxu0 %v390_v15 }
  0x35   :  { %263 = vmatprep.subr.bf16.mxu0 %v391_v16 }
  0x38   :  { %264 = vmatpush1.bf16.msra.mxu0 %v393_v17 }
  0x39   :  { %265 = vmatprep.subr.bf16.mxu0 %v394_v18 }
  0x3c   :  { %266 = vmatpush2.bf16.msra.mxu0 %v396_v19 }
  0x3d   :  { %267 = vmatprep.subr.bf16.mxu0 %v397_v20 }
  0x40   :  { %268 = vmatpush2.bf16.msra.mxu0 %v399_v21 }
  0x41   :  { %269 = vmatprep.subr.bf16.mxu0 %v400_v22 }
  0x44   :  { %270 = vmatpush2.bf16.msra.mxu0 %v402_v23 }
  0x45   :  { %271 = vmatprep.subr.bf16.mxu0 %v403_v24 }
  0x48   :  { %272 = vmatpush2.bf16.msra.mxu0 %v405_v25 }
  0x49   :  { %273 = vmatprep.subr.bf16.mxu0 %v406_v26 }
  0x4c   :  { %274 = vmatpush2.bf16.msra.mxu0 %v408_v27 }
  0x4d   :  { %275 = vmatprep.subr.bf16.mxu0 %v409_v28 }
  0x50   :  { %276 = vmatpush2.bf16.msra.mxu0 %v411_v29 }
  0x51   :  { %277 = vmatprep.subr.bf16.mxu0 %v412_v30 }
  0x54   :  { %278 = vmatpush2.bf16.msra.mxu0 %v414_v31 }
  0x55   :  { %279 = vmatprep.subr.bf16.mxu0 %v415_v32 }
  0x58   :  { %280 = vmatpush2.bf16.msra.mxu0 %v417_v33 }
  0x5b   :  { %282 = vmatmul.mubr.bf16.vlgmr.msra.gmra.mxu0 %v331_v34 }
 0x11b   :  { %v283_v42 = vpop.f32.mrf.mxu0 }
 0x11c   :  { %v311_v43 = vadd.f32 %v304_v40, %v283_v42 }
 0x11d   :  { %v285_v44 = vpop.f32.mrf.mxu0 }
 0x11e   :  { %313 = vst [vmem:[#allocation8] sm:$0xff] %v311_v43  ;;  %v312_v45 = vadd.f32 %v308_v41, %v285_v44 }
 0x11f   :  { %v287_v46 = vpop.f32.mrf.mxu0 }
 0x120   :  { %314 = vst [vmem:[#allocation8 + $0x8] sm:$0xff] %v312_v45 }
 0x121   :  { %v288_v47 = vpop.f32.mrf.mxu0 }
 0x122   :  { %471 = shalt.err (!%p468_p0)
}
 0x123   :  { %324 = dma.vmem_to_hbm [thread:$0]  %s322_s25, 256, %s526_s3, [#allocation5]  }
 0x124   :  { %484 = dma.done.wait [#allocation5], 256  }
 0x125   :  { %485 = vsyncadd [#allocation5], 4294967040 }
 0x126   :  { %328 = vsyncpa [#allocation4], 1 }
 0x127   :  { %329 = vsyncpa [#allocation7], 1 }
 0x128   :  { %330 = vsyncpa [#allocation5], 1 }

</bundles_post_ra>
